<compile_context>
chip_gen: v5e
topology: v5e:2x2
jax: 0.10.0
libtpu: 0.0.40
codegen_flags: <defaults>
</compile_context>

<pallas_src>
import jax
import jax.numpy as jnp
from jax.experimental import pallas as pl
from jax.experimental.pallas import tpu as pltpu

# ---- "args" for the module (small, deterministic, synthetic) ----
NUM_MAPPING_LAYERS = 2        # args.num_mapping_layers
MAP_DIM = 32                  # args.map_dim
FUSION = "concat"             # args.fusion
NUM_PRE_OUTPUT_LAYERS = 2     # args.num_pre_output_layers
NUM_CLASS = 2                 # args.num_class
IMAGE_HIDDEN = 64             # image_encoder.config.hidden_size (stand-in)
TEXT_HIDDEN = 48              # text_encoder.config.hidden_size (stand-in)
BATCH = 2

IN_DIM = IMAGE_HIDDEN + TEXT_HIDDEN   # 112: fused [img | txt] input width
PAD = 128                              # homogeneous block width (lanes) / act rows
NCLS_ROWS = 8                          # output rows (NUM_CLASS padded to a sublane group)
MAX_TILE_B = 512                       # batch tile (lane axis), multiple of 128

# Row offsets of each homogeneous [out, in] weight block inside the packed slab.
_W0_LO, _W0_HI = 0 * PAD, 1 * PAD          # blockdiag(Wi0, Wt0): img/txt map layer 0
_W1_LO, _W1_HI = 1 * PAD, 2 * PAD          # blockdiag(Wi1, Wt1): img/txt map layer 1
_WP0_LO, _WP0_HI = 2 * PAD, 3 * PAD        # pre_output layer 0
_WP1_LO, _WP1_HI = 3 * PAD, 4 * PAD        # pre_output layer 1
_WO_LO, _WO_HI = 4 * PAD, 4 * PAD + NCLS_ROWS   # output head
W_SLAB_ROWS = _WO_HI                       # 520

# f32 for the tiny demo (tight reference tolerance); switch to jnp.bfloat16 for
# production batches — dots accumulate in f32 either way.
COMPUTE_DTYPE = jnp.float32


def clip_classifier_kernel(x_ref, w_ref, o_ref):
    f32 = jnp.float32
    cdt = w_ref.dtype

    # x: [128, TILE_B], batch on the lane axis.
    #   rows 0:112  = [img | txt] pooled features
    #   rows 112:127 = 0 (padding)
    #   row 127     = 1.0 (homogeneous "bias" row)
    x = x_ref[...]

    # Static, full-lane, sublane-aligned carve-outs of the resident weight slab.
    w0 = w_ref[_W0_LO:_W0_HI, :]     # [128, 128] block-diag image/text map layer 0
    w1 = w_ref[_W1_LO:_W1_HI, :]     # [128, 128] block-diag image/text map layer 1
    wp0 = w_ref[_WP0_LO:_WP0_HI, :]  # [128, 128] pre_output layer 0
    wp1 = w_ref[_WP1_LO:_WP1_HI, :]  # [128, 128] pre_output layer 1
    wo = w_ref[_WO_LO:_WO_HI, :]     # [8, 128]   output head

    # image_map + text_map fused as block-diagonal homogeneous matmuls
    # (Linear -> ReLU -> Linear; Dropout layers are identity in eval mode).
    # Bias rides in weight column 127 against the ones row, so each Linear is a
    # single MXU matmul with the batch filling the MXU N columns.
    h = jnp.maximum(jnp.dot(w0, x, preferred_element_type=f32), 0.0)
    h = jnp.dot(w1, h.astype(cdt), preferred_element_type=f32)
    # h rows: 0:32 = h_img, 32:64 = h_txt, 64:127 = 0, 127 = 1.0 (ones row).

    # F.normalize(p=2, dim=1) per branch: h * rsqrt(max(sumsq, eps^2))
    # (identical to h / max(||h||, eps), eps = 1e-12). Batch is on lanes, so the
    # sum-of-squares is a cheap sublane reduction per column.
    row = jax.lax.broadcasted_iota(jnp.int32, h.shape, 0)
    is_img = row < MAP_DIM
    is_txt = jnp.logical_and(row >= MAP_DIM, row < 2 * MAP_DIM)
    sq = h * h
    ss_i = jnp.sum(jnp.where(is_img, sq, 0.0), axis=0, keepdims=True)   # [1, TILE_B]
    ss_t = jnp.sum(jnp.where(is_txt, sq, 0.0), axis=0, keepdims=True)
    inv_i = jax.lax.rsqrt(jnp.maximum(ss_i, 1e-24))
    inv_t = jax.lax.rsqrt(jnp.maximum(ss_t, 1e-24))
    # Rows >= 64 (zero padding + the ones row) pass through untouched so the
    # homogeneous bias row stays exactly 1.0 for the remaining layers.
    feats = jnp.where(is_img, h * inv_i, jnp.where(is_txt, h * inv_t, h))
    # 'concat' fusion is implicit: feats rows 0:64 are already [h_img ; h_txt].

    # pre_output: Dropout(id) -> Linear -> ReLU -> Dropout(id) -> Linear -> ReLU -> Dropout(id)
    p = jnp.maximum(jnp.dot(wp0, feats.astype(cdt), preferred_element_type=f32), 0.0)
    p = jnp.maximum(jnp.dot(wp1, p.astype(cdt), preferred_element_type=f32), 0.0)

    # Output head as one more MXU matmul; logits land lane-dense as [8, TILE_B]
    # (rows 0:NUM_CLASS valid), bias folded via the ones row. Unmasked store.
    o_ref[...] = jnp.dot(wo, p.astype(cdt), preferred_element_type=f32).astype(o_ref.dtype)


def pack_params(p, compute_dtype=COMPUTE_DTYPE):
    """Pack all Linear layers into ONE [520, 128] homogeneous weight slab.

    Each layer occupies a [rows, 128] block in [out, in] orientation (the kernel
    computes W @ X^T with batch on lanes):
      * valid weights in the top-left,
      * the bias in column 127 of the valid rows (multiplied by the input's
        ones row inside the MXU),
      * element [127, 127] = 1 for every layer except the output head, so the
        ones row propagates through the whole network (ReLU(1) = 1).
    image/text map layers are packed block-diagonally so the fused input
    [img | txt] produces [h_img ; h_txt] directly.
    """
    f32 = jnp.float32

    def blockdiag(a, b):   # a: [oa, ia], b: [ob, ib] -> [oa+ob, ia+ib]
        top = jnp.concatenate([a, jnp.zeros((a.shape[0], b.shape[1]), f32)], axis=1)
        bot = jnp.concatenate([jnp.zeros((b.shape[0], a.shape[1]), f32), b], axis=1)
        return jnp.concatenate([top, bot], axis=0)

    def homog(w, b, rows, propagate_ones):
        o, i = w.shape
        blk = jnp.zeros((rows, PAD), f32)
        blk = blk.at[:o, :i].set(w)
        blk = blk.at[:o, PAD - 1].set(b.reshape(-1))
        if propagate_ones:
            blk = blk.at[PAD - 1, PAD - 1].set(1.0)
        return blk

    # params store weights as [in, out]; the slab wants [out, in].
    w0 = homog(blockdiag(p["wi0"].T, p["wt0"].T),
               jnp.concatenate([p["bi0"].reshape(-1), p["bt0"].reshape(-1)]),
               PAD, True)
    w1 = homog(blockdiag(p["wi1"].T, p["wt1"].T),
               jnp.concatenate([p["bi1"].reshape(-1), p["bt1"].reshape(-1)]),
               PAD, True)
    wp0 = homog(p["wp0"].T, p["bp0"].reshape(-1), PAD, True)
    wp1 = homog(p["wp1"].T, p["bp1"].reshape(-1), PAD, True)
    wo = homog(p["wo"].T, p["bo"].reshape(-1), NCLS_ROWS, False)
    w_slab = jnp.concatenate([w0, w1, wp0, wp1, wo], axis=0)   # [520, 128]

    # Guard the layout invariants the kernel silently relies on.
    assert w_slab.shape == (W_SLAB_ROWS, PAD)
    for lo in (_W0_LO, _W1_LO, _WP0_LO, _WP1_LO):
        # ones-row propagation entry, and nothing else on that row.
        assert float(w_slab[lo + PAD - 1, PAD - 1]) == 1.0
        assert float(jnp.max(jnp.abs(w_slab[lo + PAD - 1, : PAD - 1]))) == 0.0
    return w_slab.astype(compute_dtype)


def clip_classifier_forward(img_pooled, txt_pooled, w_slab):
    """img_pooled: [B, IMAGE_HIDDEN], txt_pooled: [B, TEXT_HIDDEN] -> logits [B, NUM_CLASS]."""
    B = img_pooled.shape[0]
    compute_dtype = w_slab.dtype

    # Homogeneous fused input: [img | txt | zero pad | 1], then batch padded and
    # transposed so batch rides on the lane axis.
    x = jnp.concatenate(
        [img_pooled, txt_pooled,
         jnp.zeros((B, PAD - IN_DIM - 1), img_pooled.dtype),
         jnp.ones((B, 1), img_pooled.dtype)], axis=1)                   # [B, 128]

    b_pad128 = -(-B // 128) * 128
    tile_b = min(MAX_TILE_B, b_pad128)
    b_pad = -(-b_pad128 // tile_b) * tile_b
    if b_pad != B:
        x = jnp.concatenate([x, jnp.zeros((b_pad - B, PAD), x.dtype)], axis=0)
    x_t = x.T.astype(compute_dtype)                                      # [128, B_pad]

    grid = (b_pad // tile_b,)
    flops = int(2 * b_pad * (4 * PAD * PAD + NCLS_ROWS * PAD))
    bytes_accessed = int(x_t.size * x_t.dtype.itemsize
                         + w_slab.size * w_slab.dtype.itemsize
                         + NCLS_ROWS * b_pad * 4)

    out = pl.pallas_call(
        clip_classifier_kernel,
        out_shape=jax.ShapeDtypeStruct((NCLS_ROWS, b_pad), jnp.float32),
        grid=grid,
        in_specs=[
            pl.BlockSpec((PAD, tile_b), lambda i: (0, i)),               # x^T, blocked on batch
            pl.BlockSpec((W_SLAB_ROWS, PAD), lambda i: (0, 0)),          # weights: VMEM-resident
        ],
        out_specs=pl.BlockSpec((NCLS_ROWS, tile_b), lambda i: (0, i)),   # lane-dense logits
        compiler_params=pltpu.CompilerParams(
            dimension_semantics=("parallel",)),                          # v7x megacore
        cost_estimate=pl.CostEstimate(
            flops=flops, transcendentals=2 * b_pad, bytes_accessed=bytes_accessed),
    )(x_t, w_slab)

    return out[:NUM_CLASS, :B].T                                         # [B, NUM_CLASS]


def init_params(key):
    """Deterministic synthetic parameter init. Linear weights stored as [in, out]."""
    def linear(k, d_in, d_out):
        kw, kb = jax.random.split(k)
        w = jax.random.normal(kw, (d_in, d_out), jnp.float32) * 0.05
        b = jax.random.normal(kb, (1, d_out), jnp.float32) * 0.01
        return w, b

    ks = jax.random.split(key, 8)
    params = {}
    params["wi0"], params["bi0"] = linear(ks[0], IMAGE_HIDDEN, MAP_DIM)
    params["wi1"], params["bi1"] = linear(ks[1], MAP_DIM, MAP_DIM)
    params["wt0"], params["bt0"] = linear(ks[2], TEXT_HIDDEN, MAP_DIM)
    params["wt1"], params["bt1"] = linear(ks[3], MAP_DIM, MAP_DIM)
    params["wp0"], params["bp0"] = linear(ks[4], 2 * MAP_DIM, MAP_DIM)   # concat fusion dim
    params["wp1"], params["bp1"] = linear(ks[5], MAP_DIM, MAP_DIM)
    params["wo"], params["bo"] = linear(ks[6], MAP_DIM, NUM_CLASS)
    return params


def reference_forward(img_pooled, txt_pooled, p):
    """Pure-JAX reference with identical semantics (for sanity check)."""
    h_i = jnp.maximum(img_pooled @ p["wi0"] + p["bi0"], 0.0) @ p["wi1"] + p["bi1"]
    h_t = jnp.maximum(txt_pooled @ p["wt0"] + p["bt0"], 0.0) @ p["wt1"] + p["bt1"]
    h_i = h_i / jnp.maximum(jnp.linalg.norm(h_i, axis=1, keepdims=True), 1e-12)
    h_t = h_t / jnp.maximum(jnp.linalg.norm(h_t, axis=1, keepdims=True), 1e-12)
    feats = jnp.concatenate([h_i, h_t], axis=1)
    z = jnp.maximum(feats @ p["wp0"] + p["bp0"], 0.0)
    z = jnp.maximum(z @ p["wp1"] + p["bp1"], 0.0)
    return z @ p["wo"] + p["bo"]


if __name__ == "__main__":
    key = jax.random.PRNGKey(0)
    k_img, k_txt, k_par = jax.random.split(key, 3)

    # Stand-ins for image_encoder(...).pooler_output / text_encoder(...).pooler_output
    img_pooled = jax.random.normal(k_img, (BATCH, IMAGE_HIDDEN), jnp.float32)
    txt_pooled = jax.random.normal(k_txt, (BATCH, TEXT_HIDDEN), jnp.float32)

    params = init_params(k_par)
    w_slab = pack_params(params)
    assert w_slab.shape == (W_SLAB_ROWS, PAD)

    # Small-batch demo (grid=(1,), TILE_B=128).
    logits = clip_classifier_forward(img_pooled, txt_pooled, w_slab)
    jax.block_until_ready(logits)
    ref = reference_forward(img_pooled, txt_pooled, params)
    assert logits.shape == (BATCH, NUM_CLASS)
    assert jnp.allclose(logits, ref, atol=1e-5, rtol=1e-5), "mismatch vs JAX reference (B=2)"

    # Exercise the multi-tile batch grid path (B=600 -> B_pad=1024, TILE_B=512, grid=(2,)).
    k2i, k2t = jax.random.split(jax.random.PRNGKey(1))
    img2 = jax.random.normal(k2i, (600, IMAGE_HIDDEN), jnp.float32)
    txt2 = jax.random.normal(k2t, (600, TEXT_HIDDEN), jnp.float32)
    logits2 = clip_classifier_forward(img2, txt2, w_slab)
    jax.block_until_ready(logits2)
    ref2 = reference_forward(img2, txt2, params)
    assert jnp.allclose(logits2, ref2, atol=1e-4, rtol=1e-4), "mismatch vs JAX reference (B=600)"

    print("KERNEL_OK")
</pallas_src>

<mosaic_0001>
module attributes {stable_mosaic.version = 11 : i64} {
  func.func @clip_classifier_kernel(%arg0: i32, %arg1: memref<128x128xf32, #tpu.memory_space<vmem>>, %arg2: memref<520x128xf32, #tpu.memory_space<vmem>>, %arg3: memref<8x128xf32, #tpu.memory_space<vmem>>) attributes {dimension_semantics = [#tpu.dimension_semantics<parallel>], iteration_bounds = array<i64: 1>, scalar_prefetch = 0 : i64, scratch_operands = 0 : i64, tpu.core_type = #tpu.core_type<tc>, window_params = [{transform_indices = @transform_0, window_bounds = array<i64: 128, 128>}, {pipeline_mode = #tpu.pipeline_mode<synchronous>, transform_indices = @transform_1, window_bounds = array<i64: 520, 128>}, {transform_indices = @transform_2, window_bounds = array<i64: 8, 128>}]} {
    %c0 = arith.constant 0 : index
    %c0_0 = arith.constant 0 : index
    %0 = vector.load %arg1[%c0, %c0_0] : memref<128x128xf32, #tpu.memory_space<vmem>>, vector<128x128xf32>
    %c0_1 = arith.constant 0 : index
    %c0_2 = arith.constant 0 : index
    %1 = vector.load %arg2[%c0_1, %c0_2] : memref<520x128xf32, #tpu.memory_space<vmem>>, vector<128x128xf32>
    %c128 = arith.constant 128 : index
    %c0_3 = arith.constant 0 : index
    %2 = vector.load %arg2[%c128, %c0_3] : memref<520x128xf32, #tpu.memory_space<vmem>>, vector<128x128xf32>
    %c256 = arith.constant 256 : index
    %c0_4 = arith.constant 0 : index
    %3 = vector.load %arg2[%c256, %c0_4] : memref<520x128xf32, #tpu.memory_space<vmem>>, vector<128x128xf32>
    %c384 = arith.constant 384 : index
    %c0_5 = arith.constant 0 : index
    %4 = vector.load %arg2[%c384, %c0_5] : memref<520x128xf32, #tpu.memory_space<vmem>>, vector<128x128xf32>
    %c512 = arith.constant 512 : index
    %c0_6 = arith.constant 0 : index
    %5 = vector.load %arg2[%c512, %c0_6] : memref<520x128xf32, #tpu.memory_space<vmem>>, vector<8x128xf32>
    %cst = arith.constant dense<0.000000e+00> : vector<128x128xf32>
    %6 = tpu.matmul %1, %0, %cst {dimension_numbers = #tpu.dot_dimension_numbers<[1], [0], [0], [1], [0, 0, 1, 1], [], []>} : vector<128x128xf32>, vector<128x128xf32>, vector<128x128xf32> -> vector<128x128xf32>
    %cst_7 = arith.constant 0.000000e+00 : f32
    %7 = vector.broadcast %cst_7 : f32 to vector<128x128xf32>
    %8 = arith.maximumf %6, %7 : vector<128x128xf32>
    %cst_8 = arith.constant dense<0.000000e+00> : vector<128x128xf32>
    %9 = tpu.matmul %2, %8, %cst_8 {dimension_numbers = #tpu.dot_dimension_numbers<[1], [0], [0], [1], [0, 0, 1, 1], [], []>} : vector<128x128xf32>, vector<128x128xf32>, vector<128x128xf32> -> vector<128x128xf32>
    %10 = tpu.iota {dimensions = array<i32: 0>} : vector<128x128xi32>
    %c32_i32 = arith.constant 32 : i32
    %11 = vector.broadcast %c32_i32 : i32 to vector<128x128xi32>
    %12 = arith.cmpi slt, %10, %11 : vector<128x128xi32>
    %c32_i32_9 = arith.constant 32 : i32
    %13 = vector.broadcast %c32_i32_9 : i32 to vector<128x128xi32>
    %14 = arith.cmpi sge, %10, %13 : vector<128x128xi32>
    %c64_i32 = arith.constant 64 : i32
    %15 = vector.broadcast %c64_i32 : i32 to vector<128x128xi32>
    %16 = arith.cmpi slt, %10, %15 : vector<128x128xi32>
    %17 = arith.andi %14, %16 : vector<128x128xi1>
    %18 = arith.mulf %9, %9 : vector<128x128xf32>
    %cst_10 = arith.constant 0.000000e+00 : f32
    %19 = vector.broadcast %cst_10 : f32 to vector<128x128xf32>
    %20 = arith.select %12, %18, %19 : vector<128x128xi1>, vector<128x128xf32>
    %cst_11 = arith.constant dense<0.000000e+00> : vector<128xf32>
    %21 = vector.multi_reduction <add>, %20, %cst_11 [0] : vector<128x128xf32> to vector<128xf32>
    %22 = vector.shape_cast %21 : vector<128xf32> to vector<1x128xf32>
    %cst_12 = arith.constant 0.000000e+00 : f32
    %23 = vector.broadcast %cst_12 : f32 to vector<128x128xf32>
    %24 = arith.select %17, %18, %23 : vector<128x128xi1>, vector<128x128xf32>
    %cst_13 = arith.constant dense<0.000000e+00> : vector<128xf32>
    %25 = vector.multi_reduction <add>, %24, %cst_13 [0] : vector<128x128xf32> to vector<128xf32>
    %26 = vector.shape_cast %25 : vector<128xf32> to vector<1x128xf32>
    %cst_14 = arith.constant 1.000000e-24 : f32
    %27 = vector.broadcast %cst_14 : f32 to vector<1x128xf32>
    %28 = arith.maximumf %22, %27 : vector<1x128xf32>
    %29 = math.rsqrt %28 : vector<1x128xf32>
    %cst_15 = arith.constant 1.000000e-24 : f32
    %30 = vector.broadcast %cst_15 : f32 to vector<1x128xf32>
    %31 = arith.maximumf %26, %30 : vector<1x128xf32>
    %32 = math.rsqrt %31 : vector<1x128xf32>
    %33 = vector.broadcast %29 : vector<1x128xf32> to vector<128x128xf32>
    %34 = arith.mulf %9, %33 : vector<128x128xf32>
    %35 = vector.broadcast %32 : vector<1x128xf32> to vector<128x128xf32>
    %36 = arith.mulf %9, %35 : vector<128x128xf32>
    %37 = arith.select %17, %36, %9 : vector<128x128xi1>, vector<128x128xf32>
    %38 = arith.select %12, %34, %37 : vector<128x128xi1>, vector<128x128xf32>
    %cst_16 = arith.constant dense<0.000000e+00> : vector<128x128xf32>
    %39 = tpu.matmul %3, %38, %cst_16 {dimension_numbers = #tpu.dot_dimension_numbers<[1], [0], [0], [1], [0, 0, 1, 1], [], []>} : vector<128x128xf32>, vector<128x128xf32>, vector<128x128xf32> -> vector<128x128xf32>
    %cst_17 = arith.constant 0.000000e+00 : f32
    %40 = vector.broadcast %cst_17 : f32 to vector<128x128xf32>
    %41 = arith.maximumf %39, %40 : vector<128x128xf32>
    %cst_18 = arith.constant dense<0.000000e+00> : vector<128x128xf32>
    %42 = tpu.matmul %4, %41, %cst_18 {dimension_numbers = #tpu.dot_dimension_numbers<[1], [0], [0], [1], [0, 0, 1, 1], [], []>} : vector<128x128xf32>, vector<128x128xf32>, vector<128x128xf32> -> vector<128x128xf32>
    %cst_19 = arith.constant 0.000000e+00 : f32
    %43 = vector.broadcast %cst_19 : f32 to vector<128x128xf32>
    %44 = arith.maximumf %42, %43 : vector<128x128xf32>
    %cst_20 = arith.constant dense<0.000000e+00> : vector<8x128xf32>
    %45 = tpu.matmul %5, %44, %cst_20 {dimension_numbers = #tpu.dot_dimension_numbers<[1], [0], [0], [1], [0, 0, 1, 1], [], []>} : vector<8x128xf32>, vector<128x128xf32>, vector<8x128xf32> -> vector<8x128xf32>
    %c0_21 = arith.constant 0 : index
    %c0_22 = arith.constant 0 : index
    %46 = vector.load %arg3[%c0_21, %c0_22] : memref<8x128xf32, #tpu.memory_space<vmem>>, vector<8x128xf32>
    tpu.vector_store %arg3[%c0_21, %c0_22], %45 {strides = array<i32>} : memref<8x128xf32, #tpu.memory_space<vmem>>, vector<8x128xf32>,
    return
  }
  func.func @transform_0(%arg0: i32) -> (i32, i32) {
    %c0_i32 = arith.constant 0 : i32
    %c0_i32_0 = arith.constant 0 : i32
    return %c0_i32, %arg0 : i32, i32
  }
  func.func @transform_1(%arg0: i32) -> (i32, i32) {
    %c0_i32 = arith.constant 0 : i32
    %c0_i32_0 = arith.constant 0 : i32
    %c0_i32_1 = arith.constant 0 : i32
    return %c0_i32, %c0_i32_0 : i32, i32
  }
  func.func @transform_2(%arg0: i32) -> (i32, i32) {
    %c0_i32 = arith.constant 0 : i32
    %c0_i32_0 = arith.constant 0 : i32
    return %c0_i32, %arg0 : i32, i32
  }
}

</mosaic_0001>

<bundles_post_ra>
// kernel: tpu_custom_call.1
= control target key start
LH: loop header
LB: loop body
LE: loop exit
PB: predicated region body
PF: predicated region fallthrough
CT: control target
= control target key end

     0   :  { %7 = vsyncpa [#allocation3], 0  ;;  %s855_s0 = inlined_call_operand.hbm [shape: f32[128,128], index: 0, kind: input, shape index: {}]   ;;  %s856_s1 = inlined_call_operand.hbm [shape: f32[520,128], index: 1, kind: input, shape index: {}]   ;;  %s857_s2 = inlined_call_operand.hbm [shape: f32[8,128], index: 2, kind: output, shape index: {}]  }
   0x1   :  { %8 = vsyncpa [#allocation6], 0 }
   0x2   :  { %9 = vsyncpa [#allocation4], 0  ;;  %s14_s11 = sshll.u32 %s855_s0, 4  ;;  %s816_s12 = smov [#allocation2]   ;;  %s15_s11 = int_to_ptr.hbm [resolvable:$true] %s14_s11 }
   0x3   :  { %s16_s13 = sshll.u32 %s816_s12, 4  ;;  %s27_s16 = sshll.u32 %s856_s1, 4  ;;  %s17_s13 = int_to_ptr.vmem [resolvable:$true] %s16_s13  ;;  %s28_s16 = int_to_ptr.hbm [resolvable:$true] %s27_s16 }
   0x4   :  { %s817_s17 = smov 128   ;;  %s818_s18 = smov 8  }
   0x5   :  { %22 = dma.hbm_to_vmem [thread:$0]  %s15_s11, 2048, %s17_s13, [#allocation3], %s817_s17, %s817_s17, %s818_s18  }
   0x6   :  { %s819_s19 = smov [#allocation5]  }
   0x7   :  { %s29_s20 = sshll.u32 %s819_s19, 4  ;;  %s30_s20 = int_to_ptr.vmem [resolvable:$true] %s29_s20 }
   0x8   :  { %35 = dma.hbm_to_vmem [thread:$0]  %s28_s16, 8320, %s30_s20, [#allocation6], %s817_s17, %s817_s17, %s818_s18  }
   0x9   :  { %810 = dma.done.wait [#allocation3], 2048  }
   0xa   :  { %811 = vsyncadd [#allocation3], 4294965248 }
   0xb   :  { %812 = dma.done.wait [#allocation6], 8320  }
   0xc   :  { %813 = vsyncadd [#allocation6], 4294958976  ;;  %v59_v0 = vld [vmem:[#allocation2 + $0x78] sm:$0xff]  ;;  %v58_v1 = vld [vmem:[#allocation2 + $0x70] sm:$0xff]  ;;  %s820_s0 = smov [#allocation7]   ;;  %s718_s23 = sshll.u32 %s857_s2, 4  ;;  %s719_s23 = int_to_ptr.hbm [resolvable:$true] %s718_s23 }
   0xd   :  { %125 = vmatpush.msra.mxu0 %v59_v0  ;;  %v57_v2 = vld [vmem:[#allocation2 + $0x68] sm:$0xff]  ;;  %v56_v3 = vld [vmem:[#allocation2 + $0x60] sm:$0xff]  ;;  %v55_v4 = vld [vmem:[#allocation2 + $0x58] sm:$0xff]  ;;  %s716_s1 = sshll.u32 %s820_s0, 4  ;;  %s717_s1 = int_to_ptr.vmem [resolvable:$true] %s716_s1 }
   0xe   :  { %v54_v5 = vld [vmem:[#allocation2 + $0x50] sm:$0xff]  ;;  %v53_v6 = vld [vmem:[#allocation2 + $0x48] sm:$0xff]  ;;  %v52_v7 = vld [vmem:[#allocation2 + $0x40] sm:$0xff] }
   0xf   :  { %126 = vmatpush.msra.mxu0 %v58_v1  ;;  %v51_v8 = vld [vmem:[#allocation2 + $0x38] sm:$0xff]  ;;  %v50_v9 = vld [vmem:[#allocation2 + $0x30] sm:$0xff]  ;;  %v49_v10 = vld [vmem:[#allocation2 + $0x28] sm:$0xff] }
  0x10   :  { %v48_v11 = vld [vmem:[#allocation2 + $0x20] sm:$0xff]  ;;  %v47_v12 = vld [vmem:[#allocation2 + $0x18] sm:$0xff]  ;;  %v46_v13 = vld [vmem:[#allocation2 + $0x10] sm:$0xff] }
  0x11   :  { %127 = vmatpush.msra.mxu0 %v57_v2  ;;  %v45_v14 = vld [vmem:[#allocation2 + $0x8] sm:$0xff]  ;;  %v44_v15 = vld [vmem:[#allocation2] sm:$0xff]  ;;  %v62_v18 = vld [vmem:[#allocation5 + $0x10] sm:$0xff] }
  0x12   :  { %v60_v16 = vld [vmem:[#allocation5] sm:$0xff]  ;;  %v61_v17 = vld [vmem:[#allocation5 + $0x8] sm:$0xff]  ;;  %v63_v19 = vld [vmem:[#allocation5 + $0x18] sm:$0xff] }
  0x13   :  { %128 = vmatpush.msra.mxu0 %v56_v3  ;;  %v64_v20 = vld [vmem:[#allocation5 + $0x20] sm:$0xff]  ;;  %v65_v21 = vld [vmem:[#allocation5 + $0x28] sm:$0xff]  ;;  %v66_v22 = vld [vmem:[#allocation5 + $0x30] sm:$0xff] }
  0x14   :  { %v67_v23 = vld [vmem:[#allocation5 + $0x38] sm:$0xff]  ;;  %v68_v24 = vld [vmem:[#allocation5 + $0x40] sm:$0xff]  ;;  %v69_v25 = vld [vmem:[#allocation5 + $0x48] sm:$0xff] }
  0x15   :  { %129 = vmatpush.msra.mxu0 %v55_v4  ;;  %v70_v26 = vld [vmem:[#allocation5 + $0x50] sm:$0xff]  ;;  %v71_v27 = vld [vmem:[#allocation5 + $0x58] sm:$0xff]  ;;  %v72_v28 = vld [vmem:[#allocation5 + $0x60] sm:$0xff] }
  0x16   :  { %v73_v29 = vld [vmem:[#allocation5 + $0x68] sm:$0xff]  ;;  %v74_v30 = vld [vmem:[#allocation5 + $0x70] sm:$0xff]  ;;  %v75_v31 = vld [vmem:[#allocation5 + $0x78] sm:$0xff] }
  0x17   :  { %130 = vmatpush.msra.mxu0 %v54_v5  ;;  %v76_v0 = vld [vmem:[#allocation5 + $0x80] sm:$0xff]  ;;  %v77_v1 = vld [vmem:[#allocation5 + $0x88] sm:$0xff]  ;;  %v78_v2 = vld [vmem:[#allocation5 + $0x90] sm:$0xff] }
  0x18   :  { %v79_v3 = vld [vmem:[#allocation5 + $0x98] sm:$0xff]  ;;  %v80_v4 = vld [vmem:[#allocation5 + $0xa0] sm:$0xff]  ;;  %v81_v5 = vld [vmem:[#allocation5 + $0xa8] sm:$0xff] }
  0x19   :  { %131 = vmatpush.msra.mxu0 %v53_v6  ;;  %v82_v6 = vld [vmem:[#allocation5 + $0xb0] sm:$0xff] }
  0x1b   :  { %132 = vmatpush.msra.mxu0 %v52_v7  ;;  %v83_v7 = vld [vmem:[#allocation5 + $0xb8] sm:$0xff] }
  0x1d   :  { %133 = vmatpush.msra.mxu0 %v51_v8  ;;  %v84_v8 = vld [vmem:[#allocation5 + $0xc0] sm:$0xff] }
  0x1f   :  { %134 = vmatpush.msra.mxu0 %v50_v9  ;;  %v85_v9 = vld [vmem:[#allocation5 + $0xc8] sm:$0xff] }
  0x21   :  { %135 = vmatpush.msra.mxu0 %v49_v10  ;;  %v86_v10 = vld [vmem:[#allocation5 + $0xd0] sm:$0xff] }
  0x23   :  { %136 = vmatpush.msra.mxu0 %v48_v11  ;;  %v87_v11 = vld [vmem:[#allocation5 + $0xd8] sm:$0xff] }
  0x25   :  { %137 = vmatpush.msra.mxu0 %v47_v12  ;;  %v88_v12 = vld [vmem:[#allocation5 + $0xe0] sm:$0xff] }
  0x27   :  { %138 = vmatpush.msra.mxu0 %v46_v13  ;;  %v89_v13 = vld [vmem:[#allocation5 + $0xe8] sm:$0xff] }
  0x29   :  { %139 = vmatpush.msra.mxu0 %v45_v14  ;;  %v90_v14 = vld [vmem:[#allocation5 + $0xf0] sm:$0xff] }
  0x2b   :  { %140 = vmatpush.msra.mxu0 %v44_v15  ;;  %v91_v15 = vld [vmem:[#allocation5 + $0xf8] sm:$0xff] }
  0x2c   :  { %141 = vmatmul.f32.vlgmr.msra.gmra.mxu0 %v60_v16 }
  0x34   :  { %144 = vmatmul.f32.gmra.mxu0 %v61_v17 }
  0x3c   :  { %147 = vmatmul.f32.gmra.mxu0 %v62_v18 }
  0x44   :  { %150 = vmatmul.f32.gmra.mxu0 %v63_v19 }
  0x4c   :  { %153 = vmatmul.f32.gmra.mxu0 %v64_v20 }
  0x54   :  { %156 = vmatmul.f32.gmra.mxu0 %v65_v21 }
  0x5c   :  { %159 = vmatmul.f32.gmra.mxu0 %v66_v22 }
  0x64   :  { %162 = vmatmul.f32.gmra.mxu0 %v67_v23 }
  0x6c   :  { %165 = vmatmul.f32.gmra.mxu0 %v68_v24 }
  0x74   :  { %168 = vmatmul.f32.gmra.mxu0 %v69_v25 }
  0x7c   :  { %171 = vmatmul.f32.gmra.mxu0 %v70_v26 }
  0x84   :  { %174 = vmatmul.f32.gmra.mxu0 %v71_v27 }
  0x8c   :  { %177 = vmatmul.f32.gmra.mxu0 %v72_v28 }
  0x94   :  { %180 = vmatmul.f32.gmra.mxu0 %v73_v29 }
  0x9c   :  { %183 = vmatmul.f32.gmra.mxu0 %v74_v30 }
  0xa4   :  { %186 = vmatmul.f32.gmra.mxu0 %v75_v31 }
  0xa9   :  { %v142_v32 = vpop.f32.mrf.mxu0 }
  0xaa   :  { %v190_v63 = vmax.f32 %v142_v32, 0.0 }
  0xb1   :  { %v145_v33 = vpop.f32.mrf.mxu0 }
  0xb2   :  { %v191_v62 = vmax.f32 %v145_v33, 0.0 }
  0xb9   :  { %v148_v34 = vpop.f32.mrf.mxu0 }
  0xba   :  { %v192_v61 = vmax.f32 %v148_v34, 0.0 }
  0xc1   :  { %v151_v35 = vpop.f32.mrf.mxu0 }
  0xc2   :  { %v193_v60 = vmax.f32 %v151_v35, 0.0 }
  0xc9   :  { %v154_v36 = vpop.f32.mrf.mxu0 }
  0xca   :  { %v194_v59 = vmax.f32 %v154_v36, 0.0 }
  0xd1   :  { %v157_v37 = vpop.f32.mrf.mxu0 }
  0xd2   :  { %v195_v58 = vmax.f32 %v157_v37, 0.0 }
  0xd9   :  { %v160_v38 = vpop.f32.mrf.mxu0 }
  0xda   :  { %v196_v57 = vmax.f32 %v160_v38, 0.0 }
  0xe1   :  { %v163_v39 = vpop.f32.mrf.mxu0 }
  0xe2   :  { %v197_v56 = vmax.f32 %v163_v39, 0.0 }
  0xe9   :  { %v166_v40 = vpop.f32.mrf.mxu0 }
  0xea   :  { %v198_v55 = vmax.f32 %v166_v40, 0.0 }
  0xf1   :  { %v169_v41 = vpop.f32.mrf.mxu0 }
  0xf2   :  { %v199_v54 = vmax.f32 %v169_v41, 0.0 }
  0xf9   :  { %v172_v42 = vpop.f32.mrf.mxu0 }
  0xfa   :  { %v200_v53 = vmax.f32 %v172_v42, 0.0 }
 0x101   :  { %v175_v43 = vpop.f32.mrf.mxu0 }
 0x102   :  { %v201_v52 = vmax.f32 %v175_v43, 0.0 }
 0x109   :  { %v178_v44 = vpop.f32.mrf.mxu0 }
 0x10a   :  { %v202_v51 = vmax.f32 %v178_v44, 0.0 }
 0x111   :  { %v181_v45 = vpop.f32.mrf.mxu0 }
 0x112   :  { %v203_v50 = vmax.f32 %v181_v45, 0.0 }
 0x119   :  { %v184_v46 = vpop.f32.mrf.mxu0 }
 0x11a   :  { %v204_v49 = vmax.f32 %v184_v46, 0.0 }
 0x121   :  { %v187_v47 = vpop.f32.mrf.mxu0 }
 0x122   :  { %v205_v48 = vmax.f32 %v187_v47, 0.0 }
 0x124   :  { %206 = vmatpush.msra.mxu1 %v205_v48 }
 0x126   :  { %207 = vmatpush.msra.mxu1 %v204_v49 }
 0x128   :  { %208 = vmatpush.msra.mxu1 %v203_v50 }
 0x12a   :  { %209 = vmatpush.msra.mxu1 %v202_v51 }
 0x12c   :  { %210 = vmatpush.msra.mxu1 %v201_v52 }
 0x12e   :  { %211 = vmatpush.msra.mxu1 %v200_v53 }
 0x130   :  { %212 = vmatpush.msra.mxu1 %v199_v54 }
 0x132   :  { %213 = vmatpush.msra.mxu1 %v198_v55 }
 0x134   :  { %214 = vmatpush.msra.mxu1 %v197_v56 }
 0x136   :  { %215 = vmatpush.msra.mxu1 %v196_v57 }
 0x138   :  { %216 = vmatpush.msra.mxu1 %v195_v58 }
 0x13a   :  { %217 = vmatpush.msra.mxu1 %v194_v59 }
 0x13c   :  { %218 = vmatpush.msra.mxu1 %v193_v60 }
 0x13e   :  { %219 = vmatpush.msra.mxu1 %v192_v61 }
 0x140   :  { %220 = vmatpush.msra.mxu1 %v191_v62 }
 0x142   :  { %221 = vmatpush.msra.mxu1 %v190_v63 }
 0x143   :  { %222 = vmatmul.f32.vlgmr.msra.gmra.mxu1 %v76_v0 }
 0x14b   :  { %225 = vmatmul.f32.gmra.mxu1 %v77_v1 }
 0x153   :  { %228 = vmatmul.f32.gmra.mxu1 %v78_v2 }
 0x15b   :  { %231 = vmatmul.f32.gmra.mxu1 %v79_v3 }
 0x163   :  { %234 = vmatmul.f32.gmra.mxu1 %v80_v4 }
 0x16b   :  { %237 = vmatmul.f32.gmra.mxu1 %v81_v5 }
 0x173   :  { %240 = vmatmul.f32.gmra.mxu1 %v82_v6 }
 0x17b   :  { %243 = vmatmul.f32.gmra.mxu1 %v83_v7 }
 0x183   :  { %246 = vmatmul.f32.gmra.mxu1 %v84_v8 }
 0x18b   :  { %249 = vmatmul.f32.gmra.mxu1 %v85_v9 }
 0x193   :  { %252 = vmatmul.f32.gmra.mxu1 %v86_v10 }
 0x19b   :  { %255 = vmatmul.f32.gmra.mxu1 %v87_v11 }
 0x1a3   :  { %258 = vmatmul.f32.gmra.mxu1 %v88_v12 }
 0x1ab   :  { %261 = vmatmul.f32.gmra.mxu1 %v89_v13 }
 0x1b3   :  { %264 = vmatmul.f32.gmra.mxu1 %v90_v14 }
 0x1bb   :  { %267 = vmatmul.f32.gmra.mxu1 %v91_v15 }
 0x1c0   :  { %v223_v16 = vpop.f32.mrf.mxu1 }
 0x1c1   :  { %v352_v18 = vmul.f32 %v223_v16, %v223_v16 }
 0x1c8   :  { %v226_v17 = vpop.f32.mrf.mxu1 }
 0x1c9   :  { %v353_v19 = vmul.f32 %v226_v17, %v226_v17 }
 0x1cb   :  { %v384_v20 = vadd.f32 %v353_v19, %v352_v18  ;;  %v92_v18 = vld [vmem:[#allocation5 + $0x100] sm:$0xff]  ;;  %v93_v19 = vld [vmem:[#allocation5 + $0x108] sm:$0xff] }
 0x1d0   :  { %v229_v21 = vpop.f32.mrf.mxu1 }
 0x1d1   :  { %v354_v22 = vmul.f32 %v229_v21, %v229_v21 }
 0x1d3   :  { %v385_v23 = vadd.f32 %v384_v20, %v354_v22  ;;  %v94_v20 = vld [vmem:[#allocation5 + $0x110] sm:$0xff]  ;;  %v96_v22 = vld [vmem:[#allocation5 + $0x120] sm:$0xff] }
 0x1d8   :  { %v232_v24 = vpop.f32.mrf.mxu1 }
 0x1d9   :  { %v355_v25 = vmul.f32 %v232_v24, %v232_v24 }
 0x1db   :  { %v386_v26 = vadd.f32 %v385_v23, %v355_v25  ;;  %v97_v23 = vld [vmem:[#allocation5 + $0x128] sm:$0xff]  ;;  %v99_v25 = vld [vmem:[#allocation5 + $0x138] sm:$0xff] }
 0x1dd   :  { %v399_v27 = vrot.slane %v386_v26, 4 }
 0x1df   :  { %v400_v28 = vadd.f32 %v399_v27, %v386_v26  ;;  %v100_v26 = vld [vmem:[#allocation5 + $0x140] sm:$0xff]  ;;  %v101_v27 = vld [vmem:[#allocation5 + $0x148] sm:$0xff] }
 0x1e0   :  { %v842_v29 = vpop.f32.mrf.mxu1 }
 0x1e1   :  { %v401_v30 = vrot.slane %v400_v28, 2  ;;  %v356_v51 = vmul.f32 %v842_v29, %v842_v29 }
 0x1e3   :  { %v402_v31 = vadd.f32 %v401_v30, %v400_v28  ;;  %v102_v28 = vld [vmem:[#allocation5 + $0x150] sm:$0xff]  ;;  %v104_v30 = vld [vmem:[#allocation5 + $0x160] sm:$0xff] }
 0x1e5   :  { %v403_v32 = vrot.slane %v402_v31, 1 }
 0x1e7   :  { %v404_v33 = vadd.f32 %v403_v32, %v402_v31  ;;  %v105_v31 = vld [vmem:[#allocation5 + $0x168] sm:$0xff]  ;;  %v106_v32 = vld [vmem:[#allocation5 + $0x170] sm:$0xff] }
 0x1e8   :  { %v844_v34 = vpop.f32.mrf.mxu1 }
 0x1e9   :  { %v442_v35 = vmax.f32 %v404_v33, 1e-24  ;;  %v357_v49 = vmul.f32 %v844_v34, %v844_v34  ;;  %v107_v33 = vld [vmem:[#allocation5 + $0x178] sm:$0xff] }
 0x1eb   :  { %734 = vrsqrt.f32 %v442_v35  ;;  %vm449_vm1 = vweird.f32 %v442_v35  ;;  %v425_v53 = vadd.f32 %v357_v49, %v356_v51 }
 0x1f0   :  { %v241_v36 = vpop.f32.mrf.mxu1 }
 0x1f1   :  { %v735_v37 = vpop.eup %734  ;;  %v358_v52 = vmul.f32 %v241_v36, %v241_v36 }
 0x1f2   :  { %v444_v38 = vmul.f32 %v735_v37, %v442_v35  ;;  %vm450_vm0 = vweird.f32 %v735_v37 }
 0x1f3   :  { %vm451_vm2 = vmor %vm449_vm1, %vm450_vm0  ;;  %v426_v55 = vadd.f32 %v425_v53, %v358_v52 }
 0x1f4   :  { %v445_v39 = vmul.f32 %v735_v37, %v444_v38 }
 0x1f6   :  { %v446_v40 = vmul.f32 0.5, %v445_v39 }
 0x1f8   :  { %v244_v41 = vpop.f32.mrf.mxu1  ;;  %v447_v42 = vsub.f32 1.5, %v446_v40 }
 0x1f9   :  { %v359_v54 = vmul.f32 %v244_v41, %v244_v41 }
 0x1fa   :  { %v448_v43 = vmul.f32 %v735_v37, %v447_v42 }
 0x1fb   :  { %v427_v56 = vadd.f32 %v426_v55, %v359_v54 }
 0x1fc   :  { %v452_v44 = vsel %vm451_vm2, %v735_v37, %v448_v43 }
 0x1fd   :  { %v467_v45 = vmul.f32 %v452_v44, %v232_v24  ;;  %v466_v46 = vmul.f32 %v452_v44, %v229_v21  ;;  %v465_v47 = vmul.f32 %v452_v44, %v226_v17  ;;  %v464_v48 = vmul.f32 %v452_v44, %v223_v16  ;;  %v95_v21 = vld [vmem:[#allocation5 + $0x118] sm:$0xff]  ;;  %v98_v24 = vld [vmem:[#allocation5 + $0x130] sm:$0xff] }
 0x1fe   :  { %v436_v58 = vrot.slane %v427_v56, 4 }
 0x200   :  { %v247_v50 = vpop.f32.mrf.mxu1  ;;  %v437_v59 = vadd.f32 %v436_v58, %v427_v56 }
 0x202   :  { %v438_v61 = vrot.slane %v437_v59, 2 }
 0x204   :  { %v439_v62 = vadd.f32 %v438_v61, %v437_v59 }
 0x206   :  { %v440_v0 = vrot.slane %v439_v62, 1 }
 0x208   :  { %v250_v57 = vpop.f32.mrf.mxu1  ;;  %v441_v1 = vadd.f32 %v440_v0, %v439_v62 }
 0x20a   :  { %v453_v3 = vmax.f32 %v441_v1, 1e-24 }
 0x20c   :  { %736 = vrsqrt.f32 %v453_v3  ;;  %vm460_vm4 = vweird.f32 %v453_v3 }
 0x210   :  { %v253_v60 = vpop.f32.mrf.mxu1 }
 0x212   :  { %v737_v5 = vpop.eup %736 }
 0x213   :  { %v455_v6 = vmul.f32 %v737_v5, %v453_v3  ;;  %vm461_vm3 = vweird.f32 %v737_v5  ;;  %v109_v3 = vld [vmem:[#allocation5 + $0x188] sm:$0xff] }
 0x214   :  { %vm462_vm5 = vmor %vm460_vm4, %vm461_vm3 }
 0x215   :  { %v456_v8 = vmul.f32 %v737_v5, %v455_v6  ;;  %v112_v6 = vld [vmem:[#allocation5 + $0x1a0] sm:$0xff] }
 0x217   :  { %v457_v10 = vmul.f32 0.5, %v456_v8  ;;  %v114_v8 = vld [vmem:[#allocation5 + $0x1b0] sm:$0xff] }
 0x218   :  { %v256_v63 = vpop.f32.mrf.mxu1 }
 0x219   :  { %v458_v11 = vsub.f32 1.5, %v457_v10  ;;  %v116_v10 = vld [vmem:[#allocation5 + $0x1c0] sm:$0xff] }
 0x21b   :  { %v459_v12 = vmul.f32 %v737_v5, %v458_v11  ;;  %v117_v11 = vld [vmem:[#allocation5 + $0x1c8] sm:$0xff] }
 0x21d   :  { %v463_v13 = vsel %vm462_vm5, %v737_v5, %v459_v12  ;;  %v111_v5 = vld [vmem:[#allocation5 + $0x198] sm:$0xff]  ;;  %v118_v12 = vld [vmem:[#allocation5 + $0x1d0] sm:$0xff] }
 0x21e   :  { %v487_v14 = vmul.f32 %v463_v13, %v244_v41  ;;  %v486_v15 = vmul.f32 %v463_v13, %v241_v36  ;;  %v485_v16 = vmul.f32 %v463_v13, %v844_v34  ;;  %v484_v17 = vmul.f32 %v463_v13, %v842_v29  ;;  %v103_v29 = vld [vmem:[#allocation5 + $0x158] sm:$0xff] }
 0x21f   :  { %v119_v13 = vld [vmem:[#allocation5 + $0x1d8] sm:$0xff] }
 0x220   :  { %v259_v2 = vpop.f32.mrf.mxu1 }
 0x228   :  { %v262_v4 = vpop.f32.mrf.mxu1 }
 0x230   :  { %v265_v7 = vpop.f32.mrf.mxu1 }
 0x238   :  { %v268_v9 = vpop.f32.mrf.mxu1 }
 0x239   :  { %528 = vmatpush.msra.mxu2 %v268_v9  ;;  %v115_v9 = vld [vmem:[#allocation5 + $0x1b8] sm:$0xff] }
 0x23b   :  { %529 = vmatpush.msra.mxu2 %v265_v7  ;;  %v113_v7 = vld [vmem:[#allocation5 + $0x1a8] sm:$0xff] }
 0x23d   :  { %530 = vmatpush.msra.mxu2 %v262_v4  ;;  %v110_v4 = vld [vmem:[#allocation5 + $0x190] sm:$0xff] }
 0x23f   :  { %531 = vmatpush.msra.mxu2 %v259_v2  ;;  %v108_v2 = vld [vmem:[#allocation5 + $0x180] sm:$0xff] }
 0x241   :  { %532 = vmatpush.msra.mxu2 %v256_v63 }
 0x243   :  { %533 = vmatpush.msra.mxu2 %v253_v60 }
 0x245   :  { %534 = vmatpush.msra.mxu2 %v250_v57 }
 0x247   :  { %535 = vmatpush.msra.mxu2 %v247_v50 }
 0x249   :  { %536 = vmatpush.msra.mxu2 %v487_v14  ;;  %v120_v14 = vld [vmem:[#allocation5 + $0x1e0] sm:$0xff] }
 0x24b   :  { %537 = vmatpush.msra.mxu2 %v486_v15  ;;  %v121_v15 = vld [vmem:[#allocation5 + $0x1e8] sm:$0xff] }
 0x24d   :  { %538 = vmatpush.msra.mxu2 %v485_v16  ;;  %v122_v16 = vld [vmem:[#allocation5 + $0x1f0] sm:$0xff] }
 0x24f   :  { %539 = vmatpush.msra.mxu2 %v484_v17  ;;  %v123_v17 = vld [vmem:[#allocation5 + $0x1f8] sm:$0xff] }
 0x251   :  { %540 = vmatpush.msra.mxu2 %v467_v45 }
 0x253   :  { %541 = vmatpush.msra.mxu2 %v466_v46 }
 0x255   :  { %542 = vmatpush.msra.mxu2 %v465_v47 }
 0x257   :  { %543 = vmatpush.msra.mxu2 %v464_v48 }
 0x258   :  { %544 = vmatmul.f32.vlgmr.msra.gmra.mxu2 %v92_v18 }
 0x260   :  { %547 = vmatmul.f32.gmra.mxu2 %v93_v19 }
 0x268   :  { %550 = vmatmul.f32.gmra.mxu2 %v94_v20 }
 0x270   :  { %553 = vmatmul.f32.gmra.mxu2 %v95_v21 }
 0x278   :  { %556 = vmatmul.f32.gmra.mxu2 %v96_v22 }
 0x280   :  { %559 = vmatmul.f32.gmra.mxu2 %v97_v23 }
 0x288   :  { %562 = vmatmul.f32.gmra.mxu2 %v98_v24 }
 0x290   :  { %565 = vmatmul.f32.gmra.mxu2 %v99_v25 }
 0x298   :  { %568 = vmatmul.f32.gmra.mxu2 %v100_v26 }
 0x2a0   :  { %571 = vmatmul.f32.gmra.mxu2 %v101_v27 }
 0x2a8   :  { %574 = vmatmul.f32.gmra.mxu2 %v102_v28 }
 0x2b0   :  { %577 = vmatmul.f32.gmra.mxu2 %v103_v29 }
 0x2b8   :  { %580 = vmatmul.f32.gmra.mxu2 %v104_v30 }
 0x2c0   :  { %583 = vmatmul.f32.gmra.mxu2 %v105_v31 }
 0x2c8   :  { %586 = vmatmul.f32.gmra.mxu2 %v106_v32 }
 0x2d0   :  { %589 = vmatmul.f32.gmra.mxu2 %v107_v33 }
 0x2db   :  { %v545_v34 = vpop.f32.mrf.mxu2 }
 0x2dc   :  { %v593_v1 = vmax.f32 %v545_v34, 0.0 }
 0x2e3   :  { %v548_v35 = vpop.f32.mrf.mxu2 }
 0x2e4   :  { %v594_v0 = vmax.f32 %v548_v35, 0.0 }
 0x2eb   :  { %v551_v36 = vpop.f32.mrf.mxu2 }
 0x2ec   :  { %v595_v63 = vmax.f32 %v551_v36, 0.0 }
 0x2f3   :  { %v554_v37 = vpop.f32.mrf.mxu2 }
 0x2f4   :  { %v596_v62 = vmax.f32 %v554_v37, 0.0 }
 0x2fb   :  { %v557_v38 = vpop.f32.mrf.mxu2 }
 0x2fc   :  { %v597_v61 = vmax.f32 %v557_v38, 0.0 }
 0x303   :  { %v560_v39 = vpop.f32.mrf.mxu2 }
 0x304   :  { %v598_v60 = vmax.f32 %v560_v39, 0.0 }
 0x30b   :  { %v563_v40 = vpop.f32.mrf.mxu2 }
 0x30c   :  { %v599_v59 = vmax.f32 %v563_v40, 0.0 }
 0x313   :  { %v566_v41 = vpop.f32.mrf.mxu2 }
 0x314   :  { %v600_v58 = vmax.f32 %v566_v41, 0.0 }
 0x31b   :  { %v569_v42 = vpop.f32.mrf.mxu2 }
 0x31c   :  { %v601_v57 = vmax.f32 %v569_v42, 0.0 }
 0x323   :  { %v572_v43 = vpop.f32.mrf.mxu2 }
 0x324   :  { %v602_v56 = vmax.f32 %v572_v43, 0.0 }
 0x32b   :  { %v575_v44 = vpop.f32.mrf.mxu2 }
 0x32c   :  { %v603_v55 = vmax.f32 %v575_v44, 0.0 }
 0x333   :  { %v578_v45 = vpop.f32.mrf.mxu2 }
 0x334   :  { %v604_v54 = vmax.f32 %v578_v45, 0.0 }
 0x33b   :  { %v581_v46 = vpop.f32.mrf.mxu2 }
 0x33c   :  { %v605_v53 = vmax.f32 %v581_v46, 0.0 }
 0x343   :  { %v584_v47 = vpop.f32.mrf.mxu2 }
 0x344   :  { %v606_v52 = vmax.f32 %v584_v47, 0.0 }
 0x34b   :  { %v587_v48 = vpop.f32.mrf.mxu2 }
 0x34c   :  { %v607_v51 = vmax.f32 %v587_v48, 0.0 }
 0x353   :  { %v590_v49 = vpop.f32.mrf.mxu2 }
 0x354   :  { %v608_v50 = vmax.f32 %v590_v49, 0.0 }
 0x356   :  { %609 = vmatpush.msra.mxu3 %v608_v50  ;;  %v124_v50 = vld [vmem:[#allocation5 + $0x200] sm:$0xff] }
 0x358   :  { %610 = vmatpush.msra.mxu3 %v607_v51 }
 0x35a   :  { %611 = vmatpush.msra.mxu3 %v606_v52 }
 0x35c   :  { %612 = vmatpush.msra.mxu3 %v605_v53 }
 0x35e   :  { %613 = vmatpush.msra.mxu3 %v604_v54 }
 0x360   :  { %614 = vmatpush.msra.mxu3 %v603_v55 }
 0x362   :  { %615 = vmatpush.msra.mxu3 %v602_v56 }
 0x364   :  { %616 = vmatpush.msra.mxu3 %v601_v57 }
 0x366   :  { %617 = vmatpush.msra.mxu3 %v600_v58 }
 0x368   :  { %618 = vmatpush.msra.mxu3 %v599_v59 }
 0x36a   :  { %619 = vmatpush.msra.mxu3 %v598_v60 }
 0x36c   :  { %620 = vmatpush.msra.mxu3 %v597_v61 }
 0x36e   :  { %621 = vmatpush.msra.mxu3 %v596_v62 }
 0x370   :  { %622 = vmatpush.msra.mxu3 %v595_v63 }
 0x372   :  { %623 = vmatpush.msra.mxu3 %v594_v0 }
 0x374   :  { %624 = vmatpush.msra.mxu3 %v593_v1 }
 0x375   :  { %625 = vmatmul.f32.vlgmr.msra.gmra.mxu3 %v108_v2 }
 0x37d   :  { %628 = vmatmul.f32.gmra.mxu3 %v109_v3 }
 0x385   :  { %631 = vmatmul.f32.gmra.mxu3 %v110_v4 }
 0x38d   :  { %634 = vmatmul.f32.gmra.mxu3 %v111_v5 }
 0x395   :  { %637 = vmatmul.f32.gmra.mxu3 %v112_v6 }
 0x39d   :  { %640 = vmatmul.f32.gmra.mxu3 %v113_v7 }
 0x3a5   :  { %643 = vmatmul.f32.gmra.mxu3 %v114_v8 }
 0x3ad   :  { %646 = vmatmul.f32.gmra.mxu3 %v115_v9 }
 0x3b5   :  { %649 = vmatmul.f32.gmra.mxu3 %v116_v10 }
 0x3bd   :  { %652 = vmatmul.f32.gmra.mxu3 %v117_v11 }
 0x3c5   :  { %655 = vmatmul.f32.gmra.mxu3 %v118_v12 }
 0x3cd   :  { %658 = vmatmul.f32.gmra.mxu3 %v119_v13 }
 0x3d5   :  { %661 = vmatmul.f32.gmra.mxu3 %v120_v14 }
 0x3dd   :  { %664 = vmatmul.f32.gmra.mxu3 %v121_v15 }
 0x3e5   :  { %667 = vmatmul.f32.gmra.mxu3 %v122_v16 }
 0x3ed   :  { %670 = vmatmul.f32.gmra.mxu3 %v123_v17 }
 0x3f8   :  { %v626_v18 = vpop.f32.mrf.mxu3 }
 0x3f9   :  { %v674_v49 = vmax.f32 %v626_v18, 0.0 }
 0x400   :  { %v629_v19 = vpop.f32.mrf.mxu3 }
 0x401   :  { %v675_v48 = vmax.f32 %v629_v19, 0.0 }
 0x408   :  { %v632_v20 = vpop.f32.mrf.mxu3 }
 0x409   :  { %v676_v47 = vmax.f32 %v632_v20, 0.0 }
 0x410   :  { %v635_v21 = vpop.f32.mrf.mxu3 }
 0x411   :  { %v677_v46 = vmax.f32 %v635_v21, 0.0 }
 0x418   :  { %v638_v22 = vpop.f32.mrf.mxu3 }
 0x419   :  { %v678_v45 = vmax.f32 %v638_v22, 0.0 }
 0x420   :  { %v641_v23 = vpop.f32.mrf.mxu3 }
 0x421   :  { %v679_v44 = vmax.f32 %v641_v23, 0.0 }
 0x428   :  { %v644_v24 = vpop.f32.mrf.mxu3 }
 0x429   :  { %v680_v43 = vmax.f32 %v644_v24, 0.0 }
 0x430   :  { %v647_v25 = vpop.f32.mrf.mxu3 }
 0x431   :  { %v681_v42 = vmax.f32 %v647_v25, 0.0 }
 0x438   :  { %v650_v26 = vpop.f32.mrf.mxu3 }
 0x439   :  { %v682_v41 = vmax.f32 %v650_v26, 0.0 }
 0x440   :  { %v653_v27 = vpop.f32.mrf.mxu3 }
 0x441   :  { %v683_v40 = vmax.f32 %v653_v27, 0.0 }
 0x448   :  { %v656_v28 = vpop.f32.mrf.mxu3 }
 0x449   :  { %v684_v39 = vmax.f32 %v656_v28, 0.0 }
 0x450   :  { %v659_v29 = vpop.f32.mrf.mxu3 }
 0x451   :  { %v685_v38 = vmax.f32 %v659_v29, 0.0 }
 0x458   :  { %v662_v30 = vpop.f32.mrf.mxu3 }
 0x459   :  { %v686_v37 = vmax.f32 %v662_v30, 0.0 }
 0x460   :  { %v665_v31 = vpop.f32.mrf.mxu3 }
 0x461   :  { %v687_v36 = vmax.f32 %v665_v31, 0.0 }
 0x468   :  { %v668_v32 = vpop.f32.mrf.mxu3 }
 0x469   :  { %v688_v35 = vmax.f32 %v668_v32, 0.0 }
 0x470   :  { %v671_v33 = vpop.f32.mrf.mxu3 }
 0x471   :  { %v689_v34 = vmax.f32 %v671_v33, 0.0 }
 0x473   :  { %690 = vmatpush.msrb.mxu0 %v689_v34 }
 0x475   :  { %691 = vmatpush.msrb.mxu0 %v688_v35 }
 0x477   :  { %692 = vmatpush.msrb.mxu0 %v687_v36 }
 0x479   :  { %693 = vmatpush.msrb.mxu0 %v686_v37 }
 0x47b   :  { %694 = vmatpush.msrb.mxu0 %v685_v38 }
 0x47d   :  { %695 = vmatpush.msrb.mxu0 %v684_v39 }
 0x47f   :  { %696 = vmatpush.msrb.mxu0 %v683_v40 }
 0x481   :  { %697 = vmatpush.msrb.mxu0 %v682_v41 }
 0x483   :  { %698 = vmatpush.msrb.mxu0 %v681_v42 }
 0x485   :  { %699 = vmatpush.msrb.mxu0 %v680_v43 }
 0x487   :  { %700 = vmatpush.msrb.mxu0 %v679_v44 }
 0x489   :  { %701 = vmatpush.msrb.mxu0 %v678_v45 }
 0x48b   :  { %702 = vmatpush.msrb.mxu0 %v677_v46 }
 0x48d   :  { %703 = vmatpush.msrb.mxu0 %v676_v47 }
 0x48f   :  { %704 = vmatpush.msrb.mxu0 %v675_v48 }
 0x491   :  { %705 = vmatpush.msrb.mxu0 %v674_v49 }
 0x492   :  { %706 = vmatmul.f32.vlgmr.msrb.gmra.mxu0 %v124_v50 }
 0x50f   :  { %v707_v51 = vpop.f32.mrf.mxu0 }
 0x510   :  { %710 = vst [vmem:[#allocation7] sm:$0xff] %v707_v51 }
 0x511   :  { %721 = dma.vmem_to_hbm [thread:$0]  %s717_s1, 128, %s719_s23, [#allocation4]  }
 0x512   :  { %814 = dma.done.wait [#allocation4], 128  }
 0x513   :  { %815 = vsyncadd [#allocation4], 4294967168 }
 0x514   :  { %726 = vsyncpa [#allocation3], 1 }
 0x515   :  { %727 = vsyncpa [#allocation6], 1 }
 0x516   :  { %728 = vsyncpa [#allocation4], 1 }

</bundles_post_ra>
